<compile_context>
chip_gen: v7x
topology: tpu7x:2x2x1
jax: 0.10.0
libtpu: 0.0.40
codegen_flags: <defaults>
</compile_context>

<pallas_src>
import jax
import jax.numpy as jnp
from jax.experimental import pallas as pl
from jax.experimental.pallas import tpu as pltpu


def _patch_embed_kernel(patches_ref, w_ref, pos_ref, out_ref):
    # patches_ref: (1, tm, K)  bf16     w_ref: (K, tn)  bf16
    # pos_ref:     (tm, tn)    f32      out_ref: (1, tm, tn)
    acc = jnp.dot(
        patches_ref[0], w_ref[...], preferred_element_type=jnp.float32
    )                                           # (tm, tn) f32 on the MXU
    out_ref[0] = (acc + pos_ref[...]).astype(out_ref.dtype)


def _row_tile(rows):
    # second-to-last block dim: multiple of 8, or the full dim
    return rows if rows <= 128 else 128


def _col_tile(cols):
    # last block dim: multiple of 128, or the full dim
    if cols <= 256:
        return cols
    if cols % 128 == 0:
        return 256
    return cols


def patch_embedding(x, w_conv, b_conv, cls_token, pos_embed, patch_size,
                    compute_dtype=jnp.bfloat16):
    """x: [B, C, H, W]; w_conv: [E, C, p, p]; b_conv: [E];
    cls_token: [1, 1, E]; pos_embed: [1, N+1, E]  ->  [B, N+1, E]"""
    B, C, H, W = x.shape
    p = patch_size
    E = w_conv.shape[0]
    Hp, Wp = H // p, W // p
    N = Hp * Wp
    K = C * p * p
    S = N + 1

    # --- wrapper glue: im2col with (c, ph, pw) ordering (matches Conv2d) ---
    # TODO(synk): for v5e, accept NHWC input or DMA row-strips from HBM inside
    # the kernel to avoid materializing this second copy of the image in HBM.
    patches = x.reshape(B, C, Hp, p, Wp, p)
    patches = patches.transpose(0, 2, 4, 1, 3, 5).reshape(B, N, K)
    # Prepend a zero row: (0 @ W) = 0, so row 0 of the output becomes exactly
    # pos_fused[0] = cls + pos[0]. Keeps all kernel stores 0-row-aligned.
    patches_ext = jnp.pad(patches, ((0, 0), (1, 0), (0, 0))).astype(compute_dtype)

    w_mat = w_conv.reshape(E, K).T.astype(compute_dtype)          # [K, E]

    # Fused bias / cls / position table (one-time O(S*E) work in the wrapper).
    pos = pos_embed.reshape(S, E).astype(jnp.float32)
    pos_fused = pos.at[1:].add(b_conv.astype(jnp.float32))
    pos_fused = pos_fused.at[0].add(cls_token.reshape(E).astype(jnp.float32))

    tm = _row_tile(S)
    tn = _col_tile(E)
    grid = (B, pl.cdiv(S, tm), pl.cdiv(E, tn))

    out = pl.pallas_call(
        _patch_embed_kernel,
        out_shape=jax.ShapeDtypeStruct((B, S, E), x.dtype),
        grid_spec=pltpu.PrefetchScalarGridSpec(
            num_scalar_prefetch=0,
            grid=grid,
            in_specs=[
                pl.BlockSpec((1, tm, K), lambda b, i, j: (b, i, 0)),
                pl.BlockSpec((K, tn), lambda b, i, j: (0, j)),
                pl.BlockSpec((tm, tn), lambda b, i, j: (i, j)),
            ],
            out_specs=pl.BlockSpec((1, tm, tn), lambda b, i, j: (b, i, j)),
        ),
        compiler_params=pltpu.CompilerParams(
            dimension_semantics=("parallel", "parallel", "parallel"),
        ),
    )(patches_ext, w_mat, pos_fused)
    return out


def reference(x, w_conv, b_conv, cls_token, pos_embed, patch_size):
    """Pure-JAX (f32) reference matching the PyTorch forward."""
    B, C, H, W = x.shape
    p = patch_size
    E = w_conv.shape[0]
    proj = jax.lax.conv_general_dilated(
        x, w_conv, window_strides=(p, p), padding="VALID",
        dimension_numbers=("NCHW", "OIHW", "NCHW"),
    ) + b_conv[None, :, None, None]                      # [B, E, Hp, Wp]
    proj = proj.reshape(B, E, -1).transpose(0, 2, 1)     # [B, N, E]
    cls = jnp.broadcast_to(cls_token, (B, 1, E))
    return jnp.concatenate([cls, proj], axis=1) + pos_embed


if __name__ == "__main__":
    # Small shapes: img_size=16, patch_size=4, in_channels=4, embed_dim=32
    B, C, H, W = 2, 4, 16, 16
    patch_size = 4
    embed_dim = 32
    num_patches = (H // patch_size) * (W // patch_size)

    key = jax.random.PRNGKey(0)
    kx, kw, kb, kc, kp = jax.random.split(key, 5)
    x = jax.random.normal(kx, (B, C, H, W), dtype=jnp.float32)
    w_conv = jax.random.normal(
        kw, (embed_dim, C, patch_size, patch_size), dtype=jnp.float32) * 0.02
    b_conv = jax.random.normal(kb, (embed_dim,), dtype=jnp.float32) * 0.02
    # PyTorch initializes cls_token / position_embed to zeros; use small random
    # values so the additions are actually exercised.
    cls_token = jax.random.normal(kc, (1, 1, embed_dim), dtype=jnp.float32) * 0.02
    pos_embed = jax.random.normal(
        kp, (1, num_patches + 1, embed_dim), dtype=jnp.float32) * 0.02

    out = patch_embedding(x, w_conv, b_conv, cls_token, pos_embed, patch_size)
    out = jax.block_until_ready(out)

    ref = reference(x, w_conv, b_conv, cls_token, pos_embed, patch_size)
    assert out.shape == (B, num_patches + 1, embed_dim), out.shape
    # Kernel feeds the MXU in bf16 (f32 accumulate); compare against the pure
    # f32 conv reference with a tolerance covering bf16 input rounding.
    assert jnp.allclose(out, ref, atol=2e-2, rtol=2e-2), "mismatch vs reference"
    print("KERNEL_OK")
</pallas_src>

<mosaic_0001>
module attributes {stable_mosaic.version = 11 : i64} {
  func.func @_patch_embed_kernel(%arg0: i32, %arg1: i32, %arg2: i32, %arg3: memref<1x17x64xbf16, #tpu.memory_space<vmem>>, %arg4: memref<64x32xbf16, #tpu.memory_space<vmem>>, %arg5: memref<17x32xf32, #tpu.memory_space<vmem>>, %arg6: memref<1x17x32xf32, #tpu.memory_space<vmem>>) attributes {dimension_semantics = [#tpu.dimension_semantics<parallel>, #tpu.dimension_semantics<parallel>, #tpu.dimension_semantics<parallel>], iteration_bounds = array<i64: 2, 1, 1>, scalar_prefetch = 0 : i64, scratch_operands = 0 : i64, tpu.core_type = #tpu.core_type<tc>, window_params = [{transform_indices = @transform_0, window_bounds = array<i64: 1, 17, 64>}, {transform_indices = @transform_1, window_bounds = array<i64: 64, 32>}, {transform_indices = @transform_2, window_bounds = array<i64: 17, 32>}, {transform_indices = @transform_3, window_bounds = array<i64: 1, 17, 32>}]} {
    %c0 = arith.constant 0 : index
    %c0_0 = arith.constant 0 : index
    %c0_1 = arith.constant 0 : index
    %0 = vector.load %arg3[%c0, %c0_0, %c0_1] : memref<1x17x64xbf16, #tpu.memory_space<vmem>>, vector<1x17x64xbf16>
    %1 = vector.shape_cast %0 : vector<1x17x64xbf16> to vector<17x64xbf16>
    %c0_2 = arith.constant 0 : index
    %c0_3 = arith.constant 0 : index
    %2 = vector.load %arg4[%c0_2, %c0_3] : memref<64x32xbf16, #tpu.memory_space<vmem>>, vector<64x32xbf16>
    %cst = arith.constant dense<0.000000e+00> : vector<17x32xf32>
    %3 = tpu.matmul %1, %2, %cst {dimension_numbers = #tpu.dot_dimension_numbers<[1], [0], [0], [1], [0, 0, 1, 1], [], []>} : vector<17x64xbf16>, vector<64x32xbf16>, vector<17x32xf32> -> vector<17x32xf32>
    %c0_4 = arith.constant 0 : index
    %c0_5 = arith.constant 0 : index
    %4 = vector.load %arg5[%c0_4, %c0_5] : memref<17x32xf32, #tpu.memory_space<vmem>>, vector<17x32xf32>
    %5 = arith.addf %3, %4 : vector<17x32xf32>
    %c0_6 = arith.constant 0 : index
    %c0_7 = arith.constant 0 : index
    %c0_8 = arith.constant 0 : index
    %6 = vector.load %arg6[%c0_6, %c0_7, %c0_8] : memref<1x17x32xf32, #tpu.memory_space<vmem>>, vector<1x17x32xf32>
    %7 = vector.shape_cast %6 : vector<1x17x32xf32> to vector<17x32xf32>
    %8 = vector.shape_cast %5 : vector<17x32xf32> to vector<1x17x32xf32>
    tpu.vector_store %arg6[%c0_6, %c0_7, %c0_8], %8 {strides = array<i32>} : memref<1x17x32xf32, #tpu.memory_space<vmem>>, vector<1x17x32xf32>,
    return
  }
  func.func @transform_0(%arg0: i32, %arg1: i32, %arg2: i32) -> (i32, i32, i32) {
    %c0_i32 = arith.constant 0 : i32
    %c0_i32_0 = arith.constant 0 : i32
    return %arg0, %arg1, %c0_i32 : i32, i32, i32
  }
  func.func @transform_1(%arg0: i32, %arg1: i32, %arg2: i32) -> (i32, i32) {
    %c0_i32 = arith.constant 0 : i32
    %c0_i32_0 = arith.constant 0 : i32
    return %c0_i32, %arg2 : i32, i32
  }
  func.func @transform_2(%arg0: i32, %arg1: i32, %arg2: i32) -> (i32, i32) {
    %c0_i32 = arith.constant 0 : i32
    return %arg1, %arg2 : i32, i32
  }
  func.func @transform_3(%arg0: i32, %arg1: i32, %arg2: i32) -> (i32, i32, i32) {
    %c0_i32 = arith.constant 0 : i32
    return %arg0, %arg1, %arg2 : i32, i32, i32
  }
}

</mosaic_0001>

<bundles_post_ra>
// kernel: tpu_custom_call.1
= control target key start
LH: loop header
LB: loop body
LE: loop exit
PB: predicated region body
PF: predicated region fallthrough
CT: control target
= control target key end

     0   :  { %s628_s12 = smov 0   ;;  %s630_s13 = smov 0   ;;  %s682_s0 = inlined_call_operand.vmem [shape: bf16[2,17,64], index: 0, kind: input, shape index: {}]   ;;  %s683_s1 = inlined_call_operand.vmem [shape: bf16[64,32], index: 1, kind: input, shape index: {}]   ;;  %s684_s2 = inlined_call_operand.vmem [shape: f32[17,32], index: 2, kind: input, shape index: {}]   ;;  %s685_s3 = inlined_call_operand.vmem [shape: f32[2,17,32], index: 3, kind: output, shape index: {}]  }
   0x1   :  { %s632_s14 = smov 0  }
   0x2 LB: > { %s32_s15 = sadd.s32 1, %s602_s13  ;;  %p521_p0 = scmp.ge.s32.totalorder %s606_s14, 1  ;;  %s606_s14 = sphi %s632_s14, %s13_s14   ;;  %s602_s13 = sphi %s630_s13, %s687_s13   ;;  %s598_s12 = sphi %s628_s12, %s686_s12  }
   0x3   : > { %p34_p1 = scmp.ge.s32.totalorder %s32_s15, 2  ;;  %p192_p2 = scmp.lt.s32.totalorder %s606_s14, 3 }
   0x5   : > { %s689_s15 = smov (%p34_p1, %s32_s15), 0  ;;  %p193_p3 = pnand %p521_p0, %p192_p2 }
   0x6   : > { %v578_v0 = vld [vmem:[%s683_s1] sm:$0xff] (!%p193_p3)   ;;  %p240_p4 = scmp.lt.s32.totalorder (!%p193_p3), %s598_s12, 1  ;;  %v579_v1 = vld [vmem:[%s683_s1 + $0x8] sm:$0xff] (!%p193_p3)   ;;  %v580_v2 = vld [vmem:[%s683_s1 + $0x10] sm:$0xff] (!%p193_p3)   ;;  %vm322_vm0 = vcmask (!%p193_p3), 523264   ;;  %vm380_vm1 = vcmask (!%p193_p3), 253952  }
   0x7   : > { %196 = sbr.rel (%p193_p3) target bundleno = 241 (0xf1), region = 32  ;;  %540 = vmatprep.subr.bf16.mxu0 (!%p193_p3), %v578_v0  ;;  %v581_v3 = vld [vmem:[%s683_s1 + $0x18] sm:$0xff] (!%p193_p3)   ;;  %v289_v6 = vld [vmem:[%s684_s2 + $0x10] sm:$0x1] (!%p193_p3)  ;;  %v287_v7 = vld [vmem:[%s684_s2] sm:$0xff] (!%p193_p3)  ;;  %vm377_vm2 = vcmask (!%p193_p3), 261120  }
   0x8   : > { %541 = vmatpush3.bf16.msra.mxu0 (!%p193_p3), %v578_v0  ;;  %v288_v11 = vld [vmem:[%s684_s2 + $0x8] sm:$0xff] (!%p193_p3) }
   0x9   : > { %542 = vmatprep.subr.bf16.mxu0 (!%p193_p3), %v579_v1 }
   0xc   : > { %543 = vmatpush3.bf16.msra.mxu0 (!%p193_p3), %v579_v1 }
   0xd   : > { %544 = vmatprep.subr.bf16.mxu0 (!%p193_p3), %v580_v2 }
   0xe   : > { %s691_s12 = smov (!%p240_p4, %s598_s12), 1 }
   0xf   : > { %s552_s22 = smul.u32 12, %s691_s12 }
  0x10   : > { %545 = vmatpush3.bf16.msra.mxu0 %v580_v2  ;;  %s553_s28 = smul.u32 24, %s691_s12 }
  0x11   : > { %s247_s25 = scalar_lea.vmem %s682_s0, %s552_s22  ;;  %546 = vmatprep.subr.bf16.mxu0 %v581_v3 }
  0x12   : > { %v582_v4 = vld [vmem:[%s247_s25] sm:$0xff]   ;;  %v583_v5 = vld [vmem:[%s247_s25 + $0x8] ss:$0 sps:$4 sm:$0x11]   ;;  %s273_s8 = scalar_lea.vmem %s685_s3, %s553_s28 }
  0x13   : > { %548 = vmatprep.mubr.msk.bf16.mxu0 %vm322_vm0, %v582_v4 }
  0x14   : > { %547 = vmatpush3.bf16.msra.mxu0 %v581_v3 }
  0x17   : > { %549 = vmatmul.mubr.msk.bf16.vlgmr.msra.gmra.mrb[0].mxu0 %vm322_vm0, %v583_v5 }
  0xea   : > { %v550_v8 = vpop.f32.mrb[0].mxu0 }
  0xeb   : > { %v372_v9 = vadd.f32 %v550_v8, %v289_v6  ;;  %v363_v10 = vpop.f32.mrb[1].mxu0 }
  0xec   : > { %v364_v12 = vadd.f32 %v363_v10, %v287_v7  ;;  %v551_v13 = vpop.f32.mrb[2].mxu0 }
  0xed   : > { %381 = vst.msk [vmem:[%s273_s8 + $0x10] sm:$0x1] %vm380_vm1, %v372_v9  ;;  %v366_v14 = vpop.f32.mrb[3].mxu0 }
  0xee   : > { %378 = vst.msk [vmem:[%s273_s8] sm:$0xff] %vm377_vm2, %v364_v12  ;;  %v367_v15 = vadd.f32 %v366_v14, %v288_v11 }
  0xf0   : > { %379 = vst.msk [vmem:[%s273_s8 + $0x8] sm:$0xff] %vm377_vm2, %v367_v15 }
  0xf1 PF: > { %s13_s14 = sadd.s32 1, %s606_s14   ;;  %s686_s12 = smov %s602_s13 }
  0xf2   : > { %p10_p5 = scmp.ge.s32.totalorder %s13_s14, 4   ;;  %s687_s13 = smov %s689_s15 }
  0xf4   :  { %12 = sbr.rel (!%p10_p5) target bundleno = 2 (0x2), region = 68 }

</bundles_post_ra>
